<compile_context>
chip_gen: v7x
topology: tpu7x:2x2x1
jax: 0.10.0
libtpu: 0.0.40
codegen_flags: <defaults>
</compile_context>

<pallas_src>
import functools
import math

import jax
import jax.numpy as jnp
from jax.experimental import pallas as pl
from jax.experimental.pallas import tpu as pltpu

EPS = 1e-12  # torch F.normalize default eps


def _round_up(v, m):
    return ((v + m - 1) // m) * m


def _default_batch_tiles(B):
    # v7x has 2 TensorCores per chip: split the "parallel" batch axis so both
    # stream the backbone weight concurrently.  v5e/v6e have a single TC, where
    # extra batch tiles only re-stream the weight -> use one big tile.
    try:
        kind = jax.devices()[0].device_kind.lower()
        if B >= 16 and ("v7" in kind or "7x" in kind):
            return 2
    except Exception:
        pass
    return 1


def _pick_tk(Kp, Dp):
    """Largest 128-multiple divisor of Kp whose double-buffered bf16 weight slab
    (2 * tk * Dp * 2 bytes) fits a ~20 MiB budget, capped at 2048 (no gratuitous
    zero padding of the dominant HBM operand)."""
    budget = 20 * 1024 * 1024
    cap = max(128, min(2048, (budget // (4 * Dp)) // 128 * 128))
    nk_blocks = Kp // 128
    best = 128
    for d in range(1, nk_blocks + 1):
        if nk_blocks % d == 0 and d * 128 <= cap:
            best = d * 128
    return best


def _network_kernel(x_ref, wb_ref, wc_ref, out_ref, acc_ref):
    """One (batch-tile, K-tile) grid step.

    x_ref  : [tm, tk]  bf16  flattened-input tile
    wb_ref : [tk, Dp]  bf16  backbone-weight K-slab
    wc_ref : [Dp, Cp]  bf16  pre-normalized, sigma-scaled, pre-transposed classifier
    out_ref: [tm, Cp]  f32   logits tile (resident across the K axis)
    acc_ref: [tm, Dp]  f32   feature accumulator scratch
    """
    k = pl.program_id(1)

    @pl.when(k == 0)
    def _():
        acc_ref[...] = jnp.zeros_like(acc_ref)

    # Backbone: flatten + linear, accumulated over K tiles on the MXU (f32 acc).
    acc_ref[...] += jnp.dot(
        x_ref[...], wb_ref[...], preferred_element_type=jnp.float32
    )

    @pl.when(k == pl.num_programs(1) - 1)
    def _():
        feat = acc_ref[...]
        # L2-normalize features along dim=1.  torch clamps the norm at eps,
        # equivalent to clamping the squared norm at eps**2.  rsqrt -> EUP slot.
        sumsq = jnp.sum(feat * feat, axis=1, keepdims=True)
        inv = jax.lax.rsqrt(jnp.maximum(sumsq, EPS * EPS))
        feat_n = (feat * inv).astype(wc_ref.dtype)
        # Cosine logits: classifier is already row-normalized, sigma-scaled, [D, C].
        out_ref[...] = jnp.dot(
            feat_n, wc_ref[...], preferred_element_type=jnp.float32
        )


def prepare_network_params(w_backbone, w_classifier, sigma):
    """One-time static parameter prep (hoisted out of the per-call forward).

    w_backbone  : [K, D]            synthetic backbone projection (flatten+linear)
    w_classifier: [num_classes, D]  CosineLinear weight
    sigma       : scalar            CosineLinear scale

    Returns (wb_p, wc_p, dims): lane-dense zero-padded bf16 operands and
    dims = (K, D, num_classes) for un-padding bookkeeping.
    """
    K, D = int(w_backbone.shape[0]), int(w_backbone.shape[1])
    C = int(w_classifier.shape[0])
    Kp, Dp, Cp = _round_up(K, 128), _round_up(D, 128), _round_up(C, 128)

    wb_p = (
        jnp.zeros((Kp, Dp), jnp.bfloat16)
        .at[:K, :D]
        .set(w_backbone.astype(jnp.bfloat16))
    )

    # Pre-normalize classifier rows (dim=1) once, fold sigma in, pre-transpose to
    # [D, C] so the kernel consumes a lane-major operand directly.
    wc = w_classifier.astype(jnp.float32)
    wc_n = wc / jnp.maximum(jnp.linalg.norm(wc, axis=1, keepdims=True), EPS)
    wc_n = wc_n * jnp.asarray(sigma, jnp.float32)
    wc_p = (
        jnp.zeros((Dp, Cp), jnp.bfloat16)
        .at[:D, :C]
        .set(wc_n.T.astype(jnp.bfloat16))
    )

    return wb_p, wc_p, (K, D, C)


def network_forward(x_nchw, wb_p, wc_p, dims, *, tm=None, tk=None, batch_tiles=None):
    """x_nchw: [B, C, H, W]; (wb_p, wc_p, dims) from prepare_network_params.
    Returns {'logits': [B, num_classes]} matching Network.forward / CosineLinear."""
    K, D, C = dims
    Kp, Dp = int(wb_p.shape[0]), int(wb_p.shape[1])
    Cp = int(wc_p.shape[1])
    B = int(x_nchw.shape[0])

    if batch_tiles is None:
        batch_tiles = _default_batch_tiles(B)
    if tm is None:
        tm = min(512, _round_up(max(-(-B // batch_tiles), 1), 8))
    Bp = _round_up(B, tm)
    nb = Bp // tm
    if tk is None:
        tk = _pick_tk(Kp, Dp)
    nk = Kp // tk

    # ---- Per-call input prep: flatten, cast, pad only the ragged edges ----
    x_flat = x_nchw.reshape(B, -1).astype(jnp.bfloat16)
    if B == Bp and K == Kp:
        x_p = x_flat
    else:
        x_p = jnp.zeros((Bp, Kp), jnp.bfloat16).at[:B, :K].set(x_flat)

    # VMEM footprint (double-buffered inputs/outputs + resident accumulator).
    footprint = (
        2 * tm * tk * 2        # x tiles (bf16)
        + 2 * tk * Dp * 2      # backbone slabs (bf16)
        + 2 * Dp * Cp * 2      # classifier block (bf16, constant index)
        + 2 * tm * Cp * 4      # logits tiles (f32)
        + tm * Dp * 4          # f32 feature accumulator
    )
    # TODO(synk): for very large num_classes, add a C grid axis and tile the
    # classifier [Dp, tn_c] instead of keeping the whole [Dp, Cp] block resident.
    vmem_limit = int(min(56 << 20, max(32 << 20, footprint * 5 // 4 + (2 << 20))))

    cost = pl.CostEstimate(
        flops=2 * Bp * Kp * Dp + 2 * Bp * Dp * Cp,
        transcendentals=Bp,
        bytes_accessed=int(
            Bp * Kp * 2 + nb * Kp * Dp * 2 + Dp * Cp * 2 + Bp * Cp * 4
        ),
    )

    logits_p = pl.pallas_call(
        _network_kernel,
        out_shape=jax.ShapeDtypeStruct((Bp, Cp), jnp.float32),
        grid_spec=pltpu.PrefetchScalarGridSpec(
            num_scalar_prefetch=0,
            grid=(nb, nk),
            in_specs=[
                pl.BlockSpec((tm, tk), lambda i, k: (i, k)),   # x tile
                pl.BlockSpec((tk, Dp), lambda i, k: (k, 0)),   # backbone K-slab
                pl.BlockSpec((Dp, Cp), lambda i, k: (0, 0)),   # classifier (constant block)
            ],
            out_specs=pl.BlockSpec((tm, Cp), lambda i, k: (i, 0)),
            scratch_shapes=[pltpu.VMEM((tm, Dp), jnp.float32)],
        ),
        compiler_params=pltpu.CompilerParams(
            dimension_semantics=("parallel", "arbitrary"),
            vmem_limit_bytes=vmem_limit,
        ),
        cost_estimate=cost,
    )(x_p, wb_p, wc_p)

    return {"logits": logits_p[:B, :C]}


if __name__ == "__main__":
    # Small deterministic shapes consistent with the module's forward.
    B, C_in, H, W = 2, 4, 16, 16
    embd_dim = 32          # kwargs['embd_dim'] -> feature_dim
    num_classes = 16       # after one update_classifer(num_classes) call

    key = jax.random.PRNGKey(0)
    k_x, k_wb, k_wc = jax.random.split(key, 3)

    x = jax.random.normal(k_x, (B, C_in, H, W), dtype=jnp.float32)

    # TODO(synk): the real backbone is an arbitrary injected nn.Module; modeled here
    # as a deterministic flatten + linear projection to feature_dim.
    K_in = C_in * H * W
    w_backbone = jax.random.normal(k_wb, (K_in, embd_dim), dtype=jnp.float32) / math.sqrt(K_in)

    # CosineLinear.reset_parameters(): uniform(-stdv, stdv), stdv = 1/sqrt(in_features); sigma = 1.
    stdv = 1.0 / math.sqrt(embd_dim)
    w_classifier = jax.random.uniform(
        k_wc, (num_classes, embd_dim), dtype=jnp.float32, minval=-stdv, maxval=stdv
    )
    sigma = jnp.float32(1.0)

    # One-time static weight prep (hoisted out of the per-call path).
    wb_p, wc_p, dims = prepare_network_params(w_backbone, w_classifier, sigma)
    wb_p, wc_p = jax.block_until_ready((wb_p, wc_p))

    fwd = jax.jit(functools.partial(network_forward, dims=dims))
    out = fwd(x, wb_p, wc_p)
    logits = jax.block_until_ready(out["logits"])

    assert logits.shape == (B, num_classes)
    assert bool(jnp.all(jnp.isfinite(logits)))
    # cosine similarities scaled by sigma=1 must lie in [-1, 1]
    assert bool(jnp.all(jnp.abs(logits) <= 1.0 + 1e-3))

    # Reference mirroring the kernel's operand dtypes (bf16 MXU operands, f32 accumulation).
    feat = jnp.dot(
        x.reshape(B, K_in).astype(jnp.bfloat16),
        w_backbone.astype(jnp.bfloat16),
        preferred_element_type=jnp.float32,
    )
    fn = feat / jnp.maximum(jnp.linalg.norm(feat, axis=1, keepdims=True), EPS)
    wn = w_classifier / jnp.maximum(
        jnp.linalg.norm(w_classifier, axis=1, keepdims=True), EPS
    )
    ref_bf16 = sigma * jnp.dot(
        fn.astype(jnp.bfloat16), wn.T.astype(jnp.bfloat16),
        preferred_element_type=jnp.float32,
    )
    assert bool(jnp.allclose(logits, ref_bf16, atol=5e-3, rtol=5e-3))

    # Sanity vs. the pure-f32 PyTorch module semantics (difference is bf16 operand rounding only).
    feat32 = x.reshape(B, K_in) @ w_backbone
    fn32 = feat32 / jnp.maximum(jnp.linalg.norm(feat32, axis=1, keepdims=True), EPS)
    ref_f32 = sigma * (fn32 @ wn.T)
    assert bool(jnp.allclose(logits, ref_f32, atol=3e-2, rtol=3e-2))

    print("KERNEL_OK")
</pallas_src>

<mosaic_0001>
module attributes {stable_mosaic.version = 11 : i64} {
  func.func @_network_kernel(%arg0: i32, %arg1: i32, %arg2: memref<8x1024xbf16, #tpu.memory_space<vmem>>, %arg3: memref<1024x128xbf16, #tpu.memory_space<vmem>>, %arg4: memref<128x128xbf16, #tpu.memory_space<vmem>>, %arg5: memref<8x128xf32, #tpu.memory_space<vmem>>, %arg6: memref<8x128xf32, #tpu.memory_space<vmem>>) attributes {dimension_semantics = [#tpu.dimension_semantics<parallel>, #tpu.dimension_semantics<arbitrary>], iteration_bounds = array<i64: 1, 1>, scalar_prefetch = 0 : i64, scratch_operands = 1 : i64, tpu.core_type = #tpu.core_type<tc>, window_params = [{transform_indices = @transform_0, window_bounds = array<i64: 8, 1024>}, {transform_indices = @transform_1, window_bounds = array<i64: 1024, 128>}, {pipeline_mode = #tpu.pipeline_mode<synchronous>, transform_indices = @transform_2, window_bounds = array<i64: 128, 128>}, {transform_indices = @transform_3, window_bounds = array<i64: 8, 128>}]} {
    %c0_i32 = arith.constant 0 : i32
    %0 = arith.cmpi eq, %arg1, %c0_i32 : i32
    %1 = arith.extui %0 : i1 to i32
    %c0_i32_0 = arith.constant 0 : i32
    %2 = arith.cmpi ne, %1, %c0_i32_0 : i32
    scf.if %2 {
      %cst_10 = arith.constant 0.000000e+00 : f32
      %12 = vector.broadcast %cst_10 : f32 to vector<8x128xf32>
      %c0_11 = arith.constant 0 : index
      %c0_12 = arith.constant 0 : index
      %13 = vector.load %arg6[%c0_11, %c0_12] : memref<8x128xf32, #tpu.memory_space<vmem>>, vector<8x128xf32>
      tpu.vector_store %arg6[%c0_11, %c0_12], %12 {strides = array<i32>} : memref<8x128xf32, #tpu.memory_space<vmem>>, vector<8x128xf32>,
    } else {
    }
    %c0 = arith.constant 0 : index
    %c0_1 = arith.constant 0 : index
    %3 = vector.load %arg6[%c0, %c0_1] : memref<8x128xf32, #tpu.memory_space<vmem>>, vector<8x128xf32>
    %c0_2 = arith.constant 0 : index
    %c0_3 = arith.constant 0 : index
    %4 = vector.load %arg2[%c0_2, %c0_3] : memref<8x1024xbf16, #tpu.memory_space<vmem>>, vector<8x1024xbf16>
    %c0_4 = arith.constant 0 : index
    %c0_5 = arith.constant 0 : index
    %5 = vector.load %arg3[%c0_4, %c0_5] : memref<1024x128xbf16, #tpu.memory_space<vmem>>, vector<1024x128xbf16>
    %cst = arith.constant dense<0.000000e+00> : vector<8x128xf32>
    %6 = tpu.matmul %4, %5, %cst {dimension_numbers = #tpu.dot_dimension_numbers<[1], [0], [0], [1], [0, 0, 1, 1], [], []>} : vector<8x1024xbf16>, vector<1024x128xbf16>, vector<8x128xf32> -> vector<8x128xf32>
    %7 = arith.addf %3, %6 : vector<8x128xf32>
    %c0_6 = arith.constant 0 : index
    %c0_7 = arith.constant 0 : index
    %8 = vector.load %arg6[%c0_6, %c0_7] : memref<8x128xf32, #tpu.memory_space<vmem>>, vector<8x128xf32>
    tpu.vector_store %arg6[%c0_6, %c0_7], %7 {strides = array<i32>} : memref<8x128xf32, #tpu.memory_space<vmem>>, vector<8x128xf32>,
    %c0_i32_8 = arith.constant 0 : i32
    %9 = arith.cmpi eq, %arg1, %c0_i32_8 : i32
    %10 = arith.extui %9 : i1 to i32
    %c0_i32_9 = arith.constant 0 : i32
    %11 = arith.cmpi ne, %10, %c0_i32_9 : i32
    scf.if %11 {
      %c0_10 = arith.constant 0 : index
      %c0_11 = arith.constant 0 : index
      %12 = vector.load %arg6[%c0_10, %c0_11] : memref<8x128xf32, #tpu.memory_space<vmem>>, vector<8x128xf32>
      %13 = arith.mulf %12, %12 : vector<8x128xf32>
      %cst_12 = arith.constant dense<0.000000e+00> : vector<8xf32>
      %14 = vector.multi_reduction <add>, %13, %cst_12 [1] : vector<8x128xf32> to vector<8xf32>
      %15 = vector.shape_cast %14 : vector<8xf32> to vector<8x1xf32>
      %cst_13 = arith.constant 1.000000e-24 : f32
      %16 = vector.broadcast %cst_13 : f32 to vector<8x1xf32>
      %17 = arith.maximumf %15, %16 : vector<8x1xf32>
      %18 = math.rsqrt %17 : vector<8x1xf32>
      %19 = vector.broadcast %18 : vector<8x1xf32> to vector<8x128xf32>
      %20 = arith.mulf %12, %19 : vector<8x128xf32>
      %21 = arith.truncf %20 : vector<8x128xf32> to vector<8x128xbf16>
      %c0_14 = arith.constant 0 : index
      %c0_15 = arith.constant 0 : index
      %22 = vector.load %arg4[%c0_14, %c0_15] : memref<128x128xbf16, #tpu.memory_space<vmem>>, vector<128x128xbf16>
      %cst_16 = arith.constant dense<0.000000e+00> : vector<8x128xf32>
      %23 = tpu.matmul %21, %22, %cst_16 {dimension_numbers = #tpu.dot_dimension_numbers<[1], [0], [0], [1], [0, 0, 1, 1], [], []>} : vector<8x128xbf16>, vector<128x128xbf16>, vector<8x128xf32> -> vector<8x128xf32>
      %c0_17 = arith.constant 0 : index
      %c0_18 = arith.constant 0 : index
      %24 = vector.load %arg5[%c0_17, %c0_18] : memref<8x128xf32, #tpu.memory_space<vmem>>, vector<8x128xf32>
      tpu.vector_store %arg5[%c0_17, %c0_18], %23 {strides = array<i32>} : memref<8x128xf32, #tpu.memory_space<vmem>>, vector<8x128xf32>,
    } else {
    }
    return
  }
  func.func @transform_0(%arg0: i32, %arg1: i32) -> (i32, i32) {
    %c0_i32 = arith.constant 0 : i32
    return %arg0, %arg1 : i32, i32
  }
  func.func @transform_1(%arg0: i32, %arg1: i32) -> (i32, i32) {
    %c0_i32 = arith.constant 0 : i32
    %c0_i32_0 = arith.constant 0 : i32
    return %arg1, %c0_i32 : i32, i32
  }
  func.func @transform_2(%arg0: i32, %arg1: i32) -> (i32, i32) {
    %c0_i32 = arith.constant 0 : i32
    %c0_i32_0 = arith.constant 0 : i32
    %c0_i32_1 = arith.constant 0 : i32
    return %c0_i32, %c0_i32_0 : i32, i32
  }
  func.func @transform_3(%arg0: i32, %arg1: i32) -> (i32, i32) {
    %c0_i32 = arith.constant 0 : i32
    %c0_i32_0 = arith.constant 0 : i32
    return %arg0, %c0_i32 : i32, i32
  }
}

</mosaic_0001>

<bundles_post_ra>
// kernel: network_forward.1
= control target key start
LH: loop header
LB: loop body
LE: loop exit
PB: predicated region body
PF: predicated region fallthrough
CT: control target
= control target key end

     0   :  { %8 = vsyncpa [#allocation4], 0  ;;  %s1170_s12 = smov [#allocation3]   ;;  %s1246_s0 = inlined_call_operand.vmem [shape: bf16[8,1024], index: 0, kind: input, shape index: {}]   ;;  %s1247_s1 = inlined_call_operand.hbm [shape: bf16[1024,128], index: 1, kind: input, shape index: {}]   ;;  %s1248_s2 = inlined_call_operand.vmem [shape: bf16[128,128], index: 2, kind: input, shape index: {}]   ;;  %s1249_s3 = inlined_call_operand.vmem [shape: f32[8,128], index: 3, kind: output, shape index: {}]  }
   0x1   :  { %s16_s13 = sshll.u32 %s1170_s12, 4  ;;  %s1146_s16 = scalar_lea.hbm %s1247_s1, 8192  ;;  %s17_s13 = int_to_ptr.vmem [resolvable:$true] %s16_s13 }
   0x2   :  { %p1147_p0 = scmp.ne.s32.totalorder %s1247_s1, %s1146_s16  ;;  %p1150_p1 = scmp.lt.u32.totalorder %s1146_s16, %s1247_s1 }
   0x4   :  { %p1152_p2 = pnand %p1150_p1, %p1147_p0 }
   0x6   :  { %1155 = shalt.err (!%p1152_p2)
}
   0x7   :  { %s1156_s21 = scalar_lea.vmem %s17_s13, 8192  ;;  %p1161_p4 = scmp.lt.s32.totalorder %s17_s13, %s17_s13 }
   0x8   :  { %p1157_p3 = scmp.ne.s32.totalorder %s17_s13, %s1156_s21  ;;  %p1162_p5 = scmp.lt.s32.totalorder %s1156_s21, %s1156_s21 }
   0xa   :  { %p1163_p6 = por %p1162_p5, %p1161_p4 }
   0xc   :  { %p1164_p7 = pnand %p1163_p6, %p1157_p3 }
   0xe   :  { %1167 = shalt.err (!%p1164_p7)
}
   0xf   :  { %s1171_s22 = smov 64   ;;  %s1172_s23 = smov 4  }
  0x10   :  { %22 = dma.hbm_to_vmem [thread:$0]  %s1247_s1, 8192, %s17_s13, [#allocation4], %s1171_s22, %s1171_s22, %s1172_s23  }
  0x11   :  { %1168 = dma.done.wait [#allocation4], 8192  }
  0x12   :  { %1169 = vsyncadd [#allocation4], 4294959104  ;;  %v1064_v0 = vld [vmem:[#allocation3 + $0x40] sm:$0xff]   ;;  %v1068_v4 = vld [vmem:[#allocation3 + $0x48] sm:$0xff]   ;;  %vm1174_vm0 = vmmov 0  }
  0x13   :  { %v1065_v1 = vld [vmem:[#allocation3 + $0xc0] sm:$0xff]   ;;  %942 = vmatprep.subr.bf16.mxu0 %v1064_v0  ;;  %v1069_v5 = vld [vmem:[#allocation3 + $0xc8] sm:$0xff]   ;;  %v1072_v8 = vld [vmem:[#allocation3 + $0x50] sm:$0xff]  }
  0x14   :  { %v1066_v2 = vld [vmem:[#allocation3] sm:$0xff]   ;;  %964 = vmatprep.subr.bf16.mxu1 %v1065_v1  ;;  %v1070_v6 = vld [vmem:[#allocation3 + $0x8] sm:$0xff]   ;;  %v1073_v9 = vld [vmem:[#allocation3 + $0xd0] sm:$0xff]  }
  0x15   :  { %v1067_v3 = vld [vmem:[#allocation3 + $0x80] sm:$0xff]   ;;  %943 = vmatpush3.bf16.msra.mxu0 %v1066_v2  ;;  %v1071_v7 = vld [vmem:[#allocation3 + $0x88] sm:$0xff]   ;;  %v1074_v10 = vld [vmem:[#allocation3 + $0x10] sm:$0xff]  }
  0x16   :  { %965 = vmatpush3.bf16.msra.mxu1 %v1067_v3  ;;  %944 = vmatprep.subr.bf16.mxu0 %v1068_v4  ;;  %v1075_v11 = vld [vmem:[#allocation3 + $0x90] sm:$0xff]   ;;  %v1076_v12 = vld [vmem:[#allocation3 + $0x58] sm:$0xff]   ;;  %v1080_v16 = vld [vmem:[#allocation3 + $0x60] sm:$0xff]  }
  0x17   :  { %966 = vmatprep.subr.bf16.mxu1 %v1069_v5  ;;  %v1077_v13 = vld [vmem:[#allocation3 + $0xd8] sm:$0xff]   ;;  %v1081_v17 = vld [vmem:[#allocation3 + $0xe0] sm:$0xff]   ;;  %v1084_v20 = vld [vmem:[#allocation3 + $0x68] sm:$0xff]  }
  0x18   :  { %v1078_v14 = vld [vmem:[#allocation3 + $0x18] sm:$0xff]   ;;  %v1082_v18 = vld [vmem:[#allocation3 + $0x20] sm:$0xff]   ;;  %v1085_v21 = vld [vmem:[#allocation3 + $0xe8] sm:$0xff]  }
  0x19   :  { %945 = vmatpush3.bf16.msra.mxu0 %v1070_v6  ;;  %v1079_v15 = vld [vmem:[#allocation3 + $0x98] sm:$0xff]   ;;  %v1083_v19 = vld [vmem:[#allocation3 + $0xa0] sm:$0xff]   ;;  %v1086_v22 = vld [vmem:[#allocation3 + $0x28] sm:$0xff]  }
  0x1a   :  { %967 = vmatpush3.bf16.msra.mxu1 %v1071_v7  ;;  %946 = vmatprep.subr.bf16.mxu0 %v1072_v8  ;;  %v1087_v23 = vld [vmem:[#allocation3 + $0xa8] sm:$0xff]   ;;  %v1088_v24 = vld [vmem:[#allocation3 + $0x70] sm:$0xff]   ;;  %v1092_v28 = vld [vmem:[#allocation3 + $0x78] sm:$0xff]  }
  0x1b   :  { %968 = vmatprep.subr.bf16.mxu1 %v1073_v9  ;;  %v1089_v25 = vld [vmem:[#allocation3 + $0xf0] sm:$0xff]   ;;  %v1093_v29 = vld [vmem:[#allocation3 + $0xf8] sm:$0xff]   ;;  %v35_v32 = vld [vmem:[%s1246_s0] sm:$0xff] }
  0x1c   :  { %v1090_v26 = vld [vmem:[#allocation3 + $0x30] sm:$0xff]   ;;  %v1094_v30 = vld [vmem:[#allocation3 + $0x38] sm:$0xff]   ;;  %v36_v33 = vld [vmem:[%s1246_s0 + $0x8] sm:$0xff]  ;;  %v862_v34 = vcombine.low %v35_v32, %v35_v32  ;;  %v863_v35 = vcombine.high %v35_v32, %v35_v32 }
  0x1d   :  { %947 = vmatpush3.bf16.msra.mxu0 %v1074_v10  ;;  %v1091_v27 = vld [vmem:[#allocation3 + $0xb0] sm:$0xff]   ;;  %v1095_v31 = vld [vmem:[#allocation3 + $0xb8] sm:$0xff]   ;;  %v864_v36 = vcombine.low %v36_v33, %v36_v33  ;;  %v865_v37 = vcombine.high %v36_v33, %v36_v33  ;;  %v1100_v38 = vld [vmem:[#allocation3 + $0x140] sm:$0xff]  }
  0x1e   :  { %969 = vmatpush3.bf16.msra.mxu1 %v1075_v11  ;;  %948 = vmatprep.subr.bf16.mxu0 %v1076_v12  ;;  %v1101_v39 = vld [vmem:[#allocation3 + $0x1c0] sm:$0xff]   ;;  %v1104_v42 = vld [vmem:[#allocation3 + $0x148] sm:$0xff]   ;;  %v1108_v46 = vld [vmem:[#allocation3 + $0x150] sm:$0xff]  }
  0x1f   :  { %970 = vmatprep.subr.bf16.mxu1 %v1077_v13  ;;  %611 = vmatprep.mubr.bf16.mxu0 %v863_v35  ;;  %v1102_v40 = vld [vmem:[#allocation3 + $0x100] sm:$0xff]   ;;  %v1105_v43 = vld [vmem:[#allocation3 + $0x1c8] sm:$0xff]   ;;  %v1109_v47 = vld [vmem:[#allocation3 + $0x1d0] sm:$0xff]   ;;  %v1173_v13 = vmov 0.0  }
  0x20   :  { %651 = vmatprep.mubr.bf16.mxu1 %v865_v37  ;;  %v1103_v41 = vld [vmem:[#allocation3 + $0x180] sm:$0xff]   ;;  %v1106_v44 = vld [vmem:[#allocation3 + $0x108] sm:$0xff]   ;;  %v1110_v48 = vld [vmem:[#allocation3 + $0x110] sm:$0xff]  }
  0x21   :  { %949 = vmatpush3.bf16.msra.mxu0 %v1078_v14  ;;  %v1107_v45 = vld [vmem:[#allocation3 + $0x188] sm:$0xff]   ;;  %v1111_v49 = vld [vmem:[#allocation3 + $0x190] sm:$0xff]   ;;  %v1112_v50 = vld [vmem:[#allocation3 + $0x158] sm:$0xff]  }
  0x22   :  { %971 = vmatpush3.bf16.msra.mxu1 %v1079_v15  ;;  %950 = vmatprep.subr.bf16.mxu0 %v1080_v16  ;;  %v1113_v51 = vld [vmem:[#allocation3 + $0x1d8] sm:$0xff]   ;;  %v1116_v54 = vld [vmem:[#allocation3 + $0x160] sm:$0xff]   ;;  %v1120_v58 = vld [vmem:[#allocation3 + $0x168] sm:$0xff]  }
  0x23   :  { %972 = vmatprep.subr.bf16.mxu1 %v1081_v17  ;;  %v1114_v52 = vld [vmem:[#allocation3 + $0x118] sm:$0xff]   ;;  %v1117_v55 = vld [vmem:[#allocation3 + $0x1e0] sm:$0xff]   ;;  %v1121_v59 = vld [vmem:[#allocation3 + $0x1e8] sm:$0xff]  }
  0x24   :  { %v1115_v53 = vld [vmem:[#allocation3 + $0x198] sm:$0xff]   ;;  %v1118_v56 = vld [vmem:[#allocation3 + $0x120] sm:$0xff]   ;;  %v1122_v60 = vld [vmem:[#allocation3 + $0x128] sm:$0xff]  }
  0x25   :  { %951 = vmatpush3.bf16.msra.mxu0 %v1082_v18  ;;  %v1119_v57 = vld [vmem:[#allocation3 + $0x1a0] sm:$0xff]   ;;  %v1123_v61 = vld [vmem:[#allocation3 + $0x1a8] sm:$0xff]   ;;  %v1124_v62 = vld [vmem:[#allocation3 + $0x170] sm:$0xff]  }
  0x26   :  { %973 = vmatpush3.bf16.msra.mxu1 %v1083_v19  ;;  %952 = vmatprep.subr.bf16.mxu0 %v1084_v20  ;;  %v1125_v63 = vld [vmem:[#allocation3 + $0x1f0] sm:$0xff]   ;;  %v1128_v2 = vld [vmem:[#allocation3 + $0x178] sm:$0xff]   ;;  %v1136_v12 = vld [vmem:[%s1248_s2] sm:$0xff]  }
  0x27   :  { %974 = vmatprep.subr.bf16.mxu1 %v1085_v21  ;;  %v1126_v0 = vld [vmem:[#allocation3 + $0x130] sm:$0xff]   ;;  %v1129_v3 = vld [vmem:[#allocation3 + $0x1f8] sm:$0xff]   ;;  %v1137_v14 = vld [vmem:[%s1248_s2 + $0x8] sm:$0xff]  }
  0x28   :  { %v1127_v1 = vld [vmem:[#allocation3 + $0x1b0] sm:$0xff]   ;;  %v1130_v4 = vld [vmem:[#allocation3 + $0x138] sm:$0xff]  }
  0x29   :  { %953 = vmatpush3.bf16.msra.mxu0 %v1086_v22  ;;  %v1131_v5 = vld [vmem:[#allocation3 + $0x1b8] sm:$0xff]   ;;  %v37_v6 = vld [vmem:[%s1246_s0 + $0x10] sm:$0xff] }
  0x2a   :  { %975 = vmatpush3.bf16.msra.mxu1 %v1087_v23  ;;  %954 = vmatprep.subr.bf16.mxu0 %v1088_v24  ;;  %v866_v7 = vcombine.low %v37_v6, %v37_v6  ;;  %v867_v8 = vcombine.high %v37_v6, %v37_v6  ;;  %v38_v9 = vld [vmem:[%s1246_s0 + $0x18] sm:$0xff]  ;;  %v1138_v15 = vld [vmem:[%s1248_s2 + $0x10] sm:$0xff]  }
  0x2b   :  { %976 = vmatprep.subr.bf16.mxu1 %v1089_v25  ;;  %v868_v10 = vcombine.low %v38_v9, %v38_v9  ;;  %v869_v11 = vcombine.high %v38_v9, %v38_v9  ;;  %v1139_v16 = vld [vmem:[%s1248_s2 + $0x18] sm:$0xff]  }
  0x2d   :  { %955 = vmatpush3.bf16.msra.mxu0 %v1090_v26 }
  0x2e   :  { %977 = vmatpush3.bf16.msra.mxu1 %v1091_v27  ;;  %956 = vmatprep.subr.bf16.mxu0 %v1092_v28 }
  0x2f   :  { %978 = vmatprep.subr.bf16.mxu1 %v1093_v29 }
  0x31   :  { %957 = vmatpush3.bf16.msra.mxu0 %v1094_v30 }
  0x32   :  { %979 = vmatpush3.bf16.msra.mxu1 %v1095_v31  ;;  %986 = vmatprep.subr.bf16.mxu0 %v1100_v38 }
  0x33   :  { %1008 = vmatprep.subr.bf16.mxu1 %v1101_v39 }
  0x34   :  { %612 = vmatmul.mubr.bf16.vlgmr.msra.gmra.mrb[0].mxu0 %v862_v34 }
  0x35   :  { %652 = vmatmul.mubr.bf16.vlgmr.msra.gmra.mrb[0].mxu1 %v864_v36  ;;  %987 = vmatpush3.bf16.msra.mxu0 %v1102_v40 }
  0x36   :  { %1009 = vmatpush3.bf16.msra.mxu1 %v1103_v41  ;;  %988 = vmatprep.subr.bf16.mxu0 %v1104_v42  ;;  %v1140_v41 = vld [vmem:[%s1248_s2 + $0x20] sm:$0xff]   ;;  %v1141_v42 = vld [vmem:[%s1248_s2 + $0x28] sm:$0xff]  }
  0x37   :  { %1010 = vmatprep.subr.bf16.mxu1 %v1105_v43  ;;  %691 = vmatprep.mubr.bf16.mxu0 %v867_v8  ;;  %v1142_v43 = vld [vmem:[%s1248_s2 + $0x30] sm:$0xff]  }
  0x38   :  { %731 = vmatprep.mubr.bf16.mxu1 %v869_v11 }
  0x39   :  { %989 = vmatpush3.bf16.msra.mxu0 %v1106_v44  ;;  %v1143_v44 = vld [vmem:[%s1248_s2 + $0x38] sm:$0xff]  }
  0x3a   :  { %1011 = vmatpush3.bf16.msra.mxu1 %v1107_v45  ;;  %990 = vmatprep.subr.bf16.mxu0 %v1108_v46 }
  0x3b   :  { %1012 = vmatprep.subr.bf16.mxu1 %v1109_v47 }
  0x3d   :  { %991 = vmatpush3.bf16.msra.mxu0 %v1110_v48 }
  0x3e   :  { %1013 = vmatpush3.bf16.msra.mxu1 %v1111_v49  ;;  %992 = vmatprep.subr.bf16.mxu0 %v1112_v50 }
  0x3f   :  { %1014 = vmatprep.subr.bf16.mxu1 %v1113_v51 }
  0x41   :  { %993 = vmatpush3.bf16.msra.mxu0 %v1114_v52 }
  0x42   :  { %1015 = vmatpush3.bf16.msra.mxu1 %v1115_v53  ;;  %994 = vmatprep.subr.bf16.mxu0 %v1116_v54 }
  0x43   :  { %1016 = vmatprep.subr.bf16.mxu1 %v1117_v55 }
  0x45   :  { %995 = vmatpush3.bf16.msra.mxu0 %v1118_v56 }
  0x46   :  { %1017 = vmatpush3.bf16.msra.mxu1 %v1119_v57  ;;  %996 = vmatprep.subr.bf16.mxu0 %v1120_v58 }
  0x47   :  { %1018 = vmatprep.subr.bf16.mxu1 %v1121_v59 }
  0x49   :  { %997 = vmatpush3.bf16.msra.mxu0 %v1122_v60 }
  0x4a   :  { %1019 = vmatpush3.bf16.msra.mxu1 %v1123_v61  ;;  %998 = vmatprep.subr.bf16.mxu0 %v1124_v62 }
  0x4b   :  { %1020 = vmatprep.subr.bf16.mxu1 %v1125_v63 }
  0x4d   :  { %999 = vmatpush3.bf16.msra.mxu0 %v1126_v0 }
  0x4e   :  { %1021 = vmatpush3.bf16.msra.mxu1 %v1127_v1  ;;  %1000 = vmatprep.subr.bf16.mxu0 %v1128_v2 }
  0x4f   :  { %1022 = vmatprep.subr.bf16.mxu1 %v1129_v3 }
  0x51   :  { %1001 = vmatpush3.bf16.msra.mxu0 %v1130_v4 }
  0x52   :  { %1023 = vmatpush3.bf16.msra.mxu1 %v1131_v5  ;;  %1039 = vmatprep.subr.bf16.mxu0 %v1173_v13 }
  0x54   :  { %692 = vmatmul.mubr.bf16.vlgmr.msra.gmra.mrb[4].mxu0 %v866_v7 }
  0x55   :  { %732 = vmatmul.mubr.bf16.vlgmr.msra.gmra.mrb[4].mxu1 %v868_v10  ;;  %1040 = vmatpush3.bf16.msra.mxu0 %v1136_v12 }
  0x56   :  { %1041 = vmatprep.subr.bf16.mxu0 %v1173_v13  ;;  %1055 = vmatprep.mubr.msk.bf16.mxu0 %vm1174_vm0, %v1173_v13 }
  0x59   :  { %1042 = vmatpush3.bf16.msra.mxu0 %v1137_v14 }
  0x5a   :  { %1043 = vmatprep.subr.bf16.mxu0 %v1173_v13 }
  0x5d   :  { %1044 = vmatpush3.bf16.msra.mxu0 %v1138_v15 }
  0x5e   :  { %1045 = vmatprep.subr.bf16.mxu0 %v1173_v13 }
  0x61   :  { %1046 = vmatpush3.bf16.msra.mxu0 %v1139_v16 }
  0x62   :  { %1047 = vmatprep.subr.bf16.mxu0 %v1173_v13 }
  0x65   :  { %1048 = vmatpush3.bf16.msra.mxu0 %v1140_v41 }
  0x66   :  { %1049 = vmatprep.subr.bf16.mxu0 %v1173_v13 }
  0x69   :  { %1050 = vmatpush3.bf16.msra.mxu0 %v1141_v42 }
  0x6a   :  { %1051 = vmatprep.subr.bf16.mxu0 %v1173_v13 }
  0x6d   :  { %1052 = vmatpush3.bf16.msra.mxu0 %v1142_v43 }
  0x6e   :  { %1053 = vmatprep.subr.bf16.mxu0 %v1173_v13 }
  0x71   :  { %1054 = vmatpush3.bf16.msra.mxu0 %v1143_v44 }
 0x107   :  { %v958_v17 = vpop.f32.mrb[0].mxu0 }
 0x108   :  { %v980_v18 = vpop.f32.mrb[0].mxu1  ;;  %v959_v19 = vpop.f32.mrb[1].mxu0 }
 0x109   :  { %v981_v20 = vpop.f32.mrb[1].mxu1  ;;  %v960_v21 = vadd.f32 %v959_v19, %v958_v17  ;;  %v961_v23 = vpop.f32.mrb[2].mxu0 }
 0x10a   :  { %v982_v22 = vadd.f32 %v981_v20, %v980_v18  ;;  %v983_v24 = vpop.f32.mrb[2].mxu1  ;;  %v962_v25 = vpop.f32.mrb[3].mxu0 }
 0x10b   :  { %v984_v26 = vpop.f32.mrb[3].mxu1 }
 0x10c   :  { %v654_v27 = vadd.f32 %v982_v22, %v960_v21 }
 0x127   :  { %v1002_v28 = vpop.f32.mrb[4].mxu0 }
 0x128   :  { %v1024_v29 = vpop.f32.mrb[4].mxu1  ;;  %v1003_v30 = vpop.f32.mrb[5].mxu0 }
 0x129   :  { %v1025_v31 = vpop.f32.mrb[5].mxu1  ;;  %v1004_v32 = vadd.f32 %v1003_v30, %v1002_v28  ;;  %v1005_v34 = vpop.f32.mrb[6].mxu0 }
 0x12a   :  { %v1026_v33 = vadd.f32 %v1025_v31, %v1024_v29  ;;  %v1027_v35 = vpop.f32.mrb[6].mxu1  ;;  %v1006_v36 = vpop.f32.mrb[7].mxu0 }
 0x12b   :  { %v1028_v37 = vpop.f32.mrb[7].mxu1  ;;  %v694_v38 = vadd.f32 %v1004_v32, %v654_v27 }
 0x12d   :  { %v734_v39 = vadd.f32 %v1026_v33, %v694_v38 }
 0x12f   :  { %v745_v40 = vmul.f32 %v734_v39, %v734_v39 }
 0x131   :  { %746 = vadd.xlane.f32.xlu0 %v745_v40 }
 0x1be   :  { %v747_v45 = vpop.xlane.xlu0 %746 }
 0x1bf   :  { %v748_v46 = vmax.f32 %v747_v45, 1e-24 }
 0x1c1   :  { %1144 = vrsqrt.f32 %v748_v46 }
 0x1cb   :  { %v1145_v47 = vpop.eup %1144 }
 0x1cc   :  { %v750_v48 = vmul.f32 %v1145_v47, %v734_v39 }
 0x1ce   :  { %v751_v49 = vpack.c.bf16 %v750_v48, %v750_v48 }
 0x1d0   :  { %1056 = vmatmul.mubr.bf16.vlgmr.msra.gmra.mrb[8].mxu0 %v751_v49 }
 0x2a3   :  { %v850_v50 = vpop.f32.mrb[8].mxu0 }
 0x2a4   :  { %856 = vst [vmem:[%s1249_s3] sm:$0xff] %v850_v50  ;;  %v1057_v51 = vpop.f32.mrb[9].mxu0 }
 0x2a5   :  { %v853_v52 = vpop.f32.mrb[10].mxu0 }
 0x2a6   :  { %v1058_v53 = vpop.f32.mrb[11].mxu0 }
 0x2a7   :  { %861 = vsyncpa [#allocation4], 1 }

</bundles_post_ra>
